<compile_context>
chip_gen: v6e
topology: v6e:2x2x1
jax: 0.10.0
libtpu: 0.0.40
codegen_flags: <defaults>
</compile_context>

<pallas_src>
import jax
import jax.numpy as jnp
import numpy as np
from jax.experimental import pallas as pl
from jax.experimental.pallas import tpu as pltpu

K = 11
PAD = (K - 1) // 2          # 5
EPS = 1e-5
NEG_SLOPE = 0.01            # nn.LeakyReLU default

# MXU input dtype: bf16 runs the MXU at full rate on v5e/v6e/v7x and halves the
# tap-stacked RHS. Accumulation and all elementwise math stay float32.
MATMUL_DTYPE = jnp.bfloat16


def _round_up(n, m):
    return (n + m - 1) // m * m


def conv_block_forward(x, params):
    """x: (B, Cin, L) float32, NCL layout (PyTorch NCW). Returns (B, Cout, L) float32."""
    B, Cin, L = x.shape
    w1, b1, g1, bt1, w2, b2, g2, bt2 = params
    Cout = w1.shape[0]
    BL = B * L

    # ---- wrapper-side layout plumbing (pure pads / transposes / reshapes) ----
    cin_p = _round_up(Cin, 8)
    cout_p = _round_up(Cout, 8)

    # activations: (B, Cin, L) -> channel-major, batch folded into lanes (Cin_p, B*L).
    # No halo lanes; conv taps are built in-kernel with pltpu.roll + segment masks.
    # Kept f32 here so the rolls/masks use the portable 32-bit XLU/VPU path; each
    # tap stack is cast to bf16 once, right before the MXU.
    xt = jnp.transpose(x, (1, 0, 2)).reshape(Cin, BL)
    xt = jnp.pad(xt, ((0, cin_p - Cin), (0, 0))).astype(jnp.float32)

    # weights: (Cout, Cin, K) -> (Cout_p, K*Cin_p) bf16, column index = k*Cin_p + c,
    # so the kernel never indexes the size-11 axis of the weights.
    def flatten_w(w, ci_p, co_p):
        w = jnp.pad(w, ((0, co_p - w.shape[0]), (0, ci_p - w.shape[1]), (0, 0)))
        return jnp.transpose(w, (0, 2, 1)).reshape(co_p, K * ci_p).astype(MATMUL_DTYPE)

    w1f = flatten_w(w1, cin_p, cout_p)
    w2f = flatten_w(w2, cout_p, cout_p)

    # BN affine params packed into one (Cout_p, 4) array: columns [g1, bt1, g2, bt2].
    gb = jnp.stack([g1, bt1, g2, bt2], axis=1)
    gb = jnp.pad(gb, ((0, cout_p - Cout), (0, 0))).astype(jnp.float32)

    # conv biases intentionally not passed: a per-channel constant before
    # training-mode BatchNorm is exactly cancelled by the mean subtraction.
    del b1, b2

    def kernel(x_ref, w1_ref, w2_ref, gb_ref, o_ref):
        # ---- hoisted, shared between both convs: per-lane position inside its
        # length-L batch segment and the 2*PAD edge-keep masks (shape (1, BL)). ----
        seg_pos = jax.lax.broadcasted_iota(jnp.int32, (1, BL), 1) % L
        keep_r = [seg_pos < (L - d) for d in range(1, PAD + 1)]   # tap shift +d
        keep_l = [seg_pos >= d for d in range(1, PAD + 1)]        # tap shift -d

        def tap_stack(act):
            """act: (C, BL) f32 -> (K*C, BL) bf16 tap-stacked matmul RHS.

            Row k*C + c is channel c shifted by d = k - PAD inside every length-L
            batch segment, with zeros shifted in at segment edges ('same' conv
            padding). pltpu.roll is a lane rotation on the XLU slot; wrap-around
            lanes are exactly the masked segment-edge lanes, so no halo buffer or
            unaligned slice/store is needed.
            """
            blocks = []
            for k in range(K):
                d = k - PAD
                if d == 0:
                    blk = act
                else:
                    blk = pltpu.roll(act, shift=(-d) % BL, axis=1)
                    mask = keep_r[d - 1] if d > 0 else keep_l[-d - 1]
                    blk = jnp.where(mask, blk, 0.0)
                blocks.append(blk)
            # concat in f32 (whole-vreg aligned blocks), one cast to the MXU dtype.
            return jnp.concatenate(blocks, axis=0).astype(MATMUL_DTYPE)

        def bn_leaky_relu(y, gamma, beta):
            """Training-mode BatchNorm1d (biased variance, centered two-pass)
            + LeakyReLU(0.01). y: (C, B*L) f32; gamma/beta: (C, 1)."""
            inv_n = 1.0 / y.shape[1]
            mean = jnp.sum(y, axis=1, keepdims=True) * inv_n
            diff = y - mean
            var = jnp.sum(diff * diff, axis=1, keepdims=True) * inv_n
            scale = gamma * jax.lax.rsqrt(var + EPS)
            h = diff * scale + beta
            return jnp.where(h > 0, h, NEG_SLOPE * h)

        # -------- conv1: one tap-stacked bf16 MXU matmul, f32 accumulate --------
        y1 = jnp.dot(w1_ref[...], tap_stack(x_ref[...]),
                     preferred_element_type=jnp.float32)           # (Cout_p, B*L) f32
        h1 = bn_leaky_relu(y1, gb_ref[:, 0:1], gb_ref[:, 1:2])

        # -------- conv2: taps built straight from in-register h1 (no scratch) ---
        y2 = jnp.dot(w2_ref[...], tap_stack(h1),
                     preferred_element_type=jnp.float32)           # (Cout_p, B*L) f32

        # -------- BN2 + LeakyReLU, single lane-dense (128-aligned) store --------
        o_ref[...] = bn_leaky_relu(y2, gb_ref[:, 2:3],
                                   gb_ref[:, 3:4]).astype(o_ref.dtype)

    vmem = pl.BlockSpec(memory_space=pltpu.MemorySpace.VMEM)
    out = pl.pallas_call(
        kernel,
        out_shape=jax.ShapeDtypeStruct((cout_p, BL), jnp.float32),
        in_specs=[vmem] * 4,
        out_specs=vmem,
    )(xt, w1f, w2f, gb)

    # back to PyTorch's (B, Cout, L) layout; drop channel padding.
    return out.reshape(cout_p, B, L).transpose(1, 0, 2)[:, :Cout, :]


# ---------------------------------------------------------------------------
# Pure-JAX float32 reference (same math, bias included) for a correctness check.
# ---------------------------------------------------------------------------
def _ref_forward(x, params):
    w1, b1, g1, bt1, w2, b2, g2, bt2 = params
    dn = ('NCW', 'OIW', 'NCW')

    def conv_bn_lrelu(inp, w, b, g, bt):
        y = jax.lax.conv_general_dilated(inp, w, window_strides=(1,),
                                         padding=[(PAD, PAD)],
                                         dimension_numbers=dn)
        y = y + b[None, :, None]
        mean = jnp.mean(y, axis=(0, 2), keepdims=True)
        var = jnp.mean((y - mean) ** 2, axis=(0, 2), keepdims=True)
        y = (y - mean) * jax.lax.rsqrt(var + EPS)
        y = y * g[None, :, None] + bt[None, :, None]
        return jnp.where(y > 0, y, NEG_SLOPE * y)

    h = conv_bn_lrelu(x, w1, b1, g1, bt1)
    return conv_bn_lrelu(h, w2, b2, g2, bt2)


def init_params(key, cin, cout):
    """Deterministic init mimicking PyTorch defaults (uniform conv, 1/0 for BN)."""
    k1, k2, k3, k4 = jax.random.split(key, 4)
    bound1 = 1.0 / np.sqrt(cin * K)
    bound2 = 1.0 / np.sqrt(cout * K)
    w1 = jax.random.uniform(k1, (cout, cin, K), jnp.float32, -bound1, bound1)
    b1 = jax.random.uniform(k2, (cout,), jnp.float32, -bound1, bound1)
    w2 = jax.random.uniform(k3, (cout, cout, K), jnp.float32, -bound2, bound2)
    b2 = jax.random.uniform(k4, (cout,), jnp.float32, -bound2, bound2)
    g1 = jnp.ones((cout,), jnp.float32)
    bt1 = jnp.zeros((cout,), jnp.float32)
    g2 = jnp.ones((cout,), jnp.float32)
    bt2 = jnp.zeros((cout,), jnp.float32)
    return (w1, b1, g1, bt1, w2, b2, g2, bt2)


if __name__ == "__main__":
    B, Cin, Cout, L = 2, 4, 8, 128

    key = jax.random.PRNGKey(0)
    kx, kp = jax.random.split(key)
    x = jax.random.normal(kx, (B, Cin, L), jnp.float32)     # NCL, like PyTorch NCW
    params = init_params(kp, Cin, Cout)

    out = conv_block_forward(x, params)
    out = jax.block_until_ready(out)

    ref = _ref_forward(x, params)
    # bf16 MXU inputs (weights + tap stacks) vs. the all-f32 reference: the two
    # BatchNorms rescale activations to unit std, so bf16 quantization shows up as
    # a few-% absolute error; tolerance loosened accordingly (perf-review item).
    np.testing.assert_allclose(np.asarray(out), np.asarray(ref),
                               rtol=5e-2, atol=5e-2)

    print("KERNEL_OK")
</pallas_src>

<mosaic_0001>
module attributes {stable_mosaic.version = 11 : i64} {
  func.func @kernel(%arg0: memref<8x256xf32, #tpu.memory_space<vmem>>, %arg1: memref<8x88xbf16, #tpu.memory_space<vmem>>, %arg2: memref<8x88xbf16, #tpu.memory_space<vmem>>, %arg3: memref<8x4xf32, #tpu.memory_space<vmem>>, %arg4: memref<8x256xf32, #tpu.memory_space<vmem>>) attributes {dimension_semantics = [], scalar_prefetch = 0 : i64, scratch_operands = 0 : i64, tpu.core_type = #tpu.core_type<tc>} {
    %0 = tpu.iota {dimensions = array<i32: 1>} : vector<1x256xi32>
    %c128_i32 = arith.constant 128 : i32
    %c0_i32 = arith.constant 0 : i32
    %1 = arith.cmpi eq, %c128_i32, %c0_i32 : i32
    %c1_i32 = arith.constant 1 : i32
    %2 = arith.select %1, %c1_i32, %c128_i32 : i32
    %3 = vector.broadcast %2 : i32 to vector<1x256xi32>
    %4 = arith.remsi %0, %3 : vector<1x256xi32>
    %c0_i32_0 = arith.constant 0 : i32
    %5 = vector.broadcast %c0_i32_0 : i32 to vector<1x256xi32>
    %6 = arith.cmpi ne, %4, %5 : vector<1x256xi32>
    %c0_i32_1 = arith.constant 0 : i32
    %7 = vector.broadcast %c0_i32_1 : i32 to vector<1x256xi32>
    %8 = arith.cmpi slt, %4, %7 : vector<1x256xi32>
    %c0_i32_2 = arith.constant 0 : i32
    %9 = arith.cmpi slt, %2, %c0_i32_2 : i32
    %10 = vector.broadcast %9 : i1 to vector<1x256xi1>
    %11 = vector.broadcast %10 : vector<1x256xi1> to vector<1x256xi1>
    %12 = arith.xori %8, %11 : vector<1x256xi1>
    %13 = arith.andi %12, %6 : vector<1x256xi1>
    %14 = vector.broadcast %2 : i32 to vector<1x256xi32>
    %15 = arith.addi %4, %14 : vector<1x256xi32>
    %16 = arith.select %13, %15, %4 : vector<1x256xi1>, vector<1x256xi32>
    %c127_i32 = arith.constant 127 : i32
    %17 = vector.broadcast %c127_i32 : i32 to vector<1x256xi32>
    %18 = arith.cmpi slt, %16, %17 : vector<1x256xi32>
    %c126_i32 = arith.constant 126 : i32
    %19 = vector.broadcast %c126_i32 : i32 to vector<1x256xi32>
    %20 = arith.cmpi slt, %16, %19 : vector<1x256xi32>
    %c125_i32 = arith.constant 125 : i32
    %21 = vector.broadcast %c125_i32 : i32 to vector<1x256xi32>
    %22 = arith.cmpi slt, %16, %21 : vector<1x256xi32>
    %c124_i32 = arith.constant 124 : i32
    %23 = vector.broadcast %c124_i32 : i32 to vector<1x256xi32>
    %24 = arith.cmpi slt, %16, %23 : vector<1x256xi32>
    %c123_i32 = arith.constant 123 : i32
    %25 = vector.broadcast %c123_i32 : i32 to vector<1x256xi32>
    %26 = arith.cmpi slt, %16, %25 : vector<1x256xi32>
    %c1_i32_3 = arith.constant 1 : i32
    %27 = vector.broadcast %c1_i32_3 : i32 to vector<1x256xi32>
    %28 = arith.cmpi sge, %16, %27 : vector<1x256xi32>
    %c2_i32 = arith.constant 2 : i32
    %29 = vector.broadcast %c2_i32 : i32 to vector<1x256xi32>
    %30 = arith.cmpi sge, %16, %29 : vector<1x256xi32>
    %c3_i32 = arith.constant 3 : i32
    %31 = vector.broadcast %c3_i32 : i32 to vector<1x256xi32>
    %32 = arith.cmpi sge, %16, %31 : vector<1x256xi32>
    %c4_i32 = arith.constant 4 : i32
    %33 = vector.broadcast %c4_i32 : i32 to vector<1x256xi32>
    %34 = arith.cmpi sge, %16, %33 : vector<1x256xi32>
    %c5_i32 = arith.constant 5 : i32
    %35 = vector.broadcast %c5_i32 : i32 to vector<1x256xi32>
    %36 = arith.cmpi sge, %16, %35 : vector<1x256xi32>
    %c0 = arith.constant 0 : index
    %c0_4 = arith.constant 0 : index
    %37 = vector.load %arg1[%c0, %c0_4] : memref<8x88xbf16, #tpu.memory_space<vmem>>, vector<8x88xbf16>
    %c0_5 = arith.constant 0 : index
    %c0_6 = arith.constant 0 : index
    %38 = vector.load %arg0[%c0_5, %c0_6] : memref<8x256xf32, #tpu.memory_space<vmem>>, vector<8x256xf32>
    %c5_i32_7 = arith.constant 5 : i32
    %39 = tpu.dynamic_rotate %38 by %c5_i32_7 dim 1 : vector<8x256xf32>, i32 -> vector<8x256xf32>
    %cst = arith.constant 0.000000e+00 : f32
    %40 = vector.shape_cast %36 : vector<1x256xi1> to vector<1x256xi1>
    %41 = vector.broadcast %40 : vector<1x256xi1> to vector<8x256xi1>
    %42 = vector.broadcast %cst : f32 to vector<8x256xf32>
    %43 = arith.select %41, %39, %42 : vector<8x256xi1>, vector<8x256xf32>
    %c4_i32_8 = arith.constant 4 : i32
    %44 = tpu.dynamic_rotate %38 by %c4_i32_8 dim 1 : vector<8x256xf32>, i32 -> vector<8x256xf32>
    %cst_9 = arith.constant 0.000000e+00 : f32
    %45 = vector.shape_cast %34 : vector<1x256xi1> to vector<1x256xi1>
    %46 = vector.broadcast %45 : vector<1x256xi1> to vector<8x256xi1>
    %47 = vector.broadcast %cst_9 : f32 to vector<8x256xf32>
    %48 = arith.select %46, %44, %47 : vector<8x256xi1>, vector<8x256xf32>
    %c3_i32_10 = arith.constant 3 : i32
    %49 = tpu.dynamic_rotate %38 by %c3_i32_10 dim 1 : vector<8x256xf32>, i32 -> vector<8x256xf32>
    %cst_11 = arith.constant 0.000000e+00 : f32
    %50 = vector.shape_cast %32 : vector<1x256xi1> to vector<1x256xi1>
    %51 = vector.broadcast %50 : vector<1x256xi1> to vector<8x256xi1>
    %52 = vector.broadcast %cst_11 : f32 to vector<8x256xf32>
    %53 = arith.select %51, %49, %52 : vector<8x256xi1>, vector<8x256xf32>
    %c2_i32_12 = arith.constant 2 : i32
    %54 = tpu.dynamic_rotate %38 by %c2_i32_12 dim 1 : vector<8x256xf32>, i32 -> vector<8x256xf32>
    %cst_13 = arith.constant 0.000000e+00 : f32
    %55 = vector.shape_cast %30 : vector<1x256xi1> to vector<1x256xi1>
    %56 = vector.broadcast %55 : vector<1x256xi1> to vector<8x256xi1>
    %57 = vector.broadcast %cst_13 : f32 to vector<8x256xf32>
    %58 = arith.select %56, %54, %57 : vector<8x256xi1>, vector<8x256xf32>
    %c1_i32_14 = arith.constant 1 : i32
    %59 = tpu.dynamic_rotate %38 by %c1_i32_14 dim 1 : vector<8x256xf32>, i32 -> vector<8x256xf32>
    %cst_15 = arith.constant 0.000000e+00 : f32
    %60 = vector.shape_cast %28 : vector<1x256xi1> to vector<1x256xi1>
    %61 = vector.broadcast %60 : vector<1x256xi1> to vector<8x256xi1>
    %62 = vector.broadcast %cst_15 : f32 to vector<8x256xf32>
    %63 = arith.select %61, %59, %62 : vector<8x256xi1>, vector<8x256xf32>
    %c255_i32 = arith.constant 255 : i32
    %64 = tpu.dynamic_rotate %38 by %c255_i32 dim 1 : vector<8x256xf32>, i32 -> vector<8x256xf32>
    %cst_16 = arith.constant 0.000000e+00 : f32
    %65 = vector.shape_cast %18 : vector<1x256xi1> to vector<1x256xi1>
    %66 = vector.broadcast %65 : vector<1x256xi1> to vector<8x256xi1>
    %67 = vector.broadcast %cst_16 : f32 to vector<8x256xf32>
    %68 = arith.select %66, %64, %67 : vector<8x256xi1>, vector<8x256xf32>
    %c254_i32 = arith.constant 254 : i32
    %69 = tpu.dynamic_rotate %38 by %c254_i32 dim 1 : vector<8x256xf32>, i32 -> vector<8x256xf32>
    %cst_17 = arith.constant 0.000000e+00 : f32
    %70 = vector.shape_cast %20 : vector<1x256xi1> to vector<1x256xi1>
    %71 = vector.broadcast %70 : vector<1x256xi1> to vector<8x256xi1>
    %72 = vector.broadcast %cst_17 : f32 to vector<8x256xf32>
    %73 = arith.select %71, %69, %72 : vector<8x256xi1>, vector<8x256xf32>
    %c253_i32 = arith.constant 253 : i32
    %74 = tpu.dynamic_rotate %38 by %c253_i32 dim 1 : vector<8x256xf32>, i32 -> vector<8x256xf32>
    %cst_18 = arith.constant 0.000000e+00 : f32
    %75 = vector.shape_cast %22 : vector<1x256xi1> to vector<1x256xi1>
    %76 = vector.broadcast %75 : vector<1x256xi1> to vector<8x256xi1>
    %77 = vector.broadcast %cst_18 : f32 to vector<8x256xf32>
    %78 = arith.select %76, %74, %77 : vector<8x256xi1>, vector<8x256xf32>
    %c252_i32 = arith.constant 252 : i32
    %79 = tpu.dynamic_rotate %38 by %c252_i32 dim 1 : vector<8x256xf32>, i32 -> vector<8x256xf32>
    %cst_19 = arith.constant 0.000000e+00 : f32
    %80 = vector.shape_cast %24 : vector<1x256xi1> to vector<1x256xi1>
    %81 = vector.broadcast %80 : vector<1x256xi1> to vector<8x256xi1>
    %82 = vector.broadcast %cst_19 : f32 to vector<8x256xf32>
    %83 = arith.select %81, %79, %82 : vector<8x256xi1>, vector<8x256xf32>
    %c251_i32 = arith.constant 251 : i32
    %84 = tpu.dynamic_rotate %38 by %c251_i32 dim 1 : vector<8x256xf32>, i32 -> vector<8x256xf32>
    %cst_20 = arith.constant 0.000000e+00 : f32
    %85 = vector.shape_cast %26 : vector<1x256xi1> to vector<1x256xi1>
    %86 = vector.broadcast %85 : vector<1x256xi1> to vector<8x256xi1>
    %87 = vector.broadcast %cst_20 : f32 to vector<8x256xf32>
    %88 = arith.select %86, %84, %87 : vector<8x256xi1>, vector<8x256xf32>
    %89 = tpu.concatenate %43, %48, %53, %58, %63, %38, %68, %73, %78, %83, %88 in 0 : vector<8x256xf32>, vector<8x256xf32>, vector<8x256xf32>, vector<8x256xf32>, vector<8x256xf32>, vector<8x256xf32>, vector<8x256xf32>, vector<8x256xf32>, vector<8x256xf32>, vector<8x256xf32>, vector<8x256xf32> -> vector<88x256xf32>
    %90 = arith.truncf %89 : vector<88x256xf32> to vector<88x256xbf16>
    %cst_21 = arith.constant dense<0.000000e+00> : vector<8x256xf32>
    %91 = tpu.matmul %37, %90, %cst_21 {dimension_numbers = #tpu.dot_dimension_numbers<[1], [0], [0], [1], [0, 0, 1, 1], [], []>} : vector<8x88xbf16>, vector<88x256xbf16>, vector<8x256xf32> -> vector<8x256xf32>
    %c0_22 = arith.constant 0 : index
    %c0_23 = arith.constant 0 : index
    %92 = vector.load %arg3[%c0_22, %c0_23] : memref<8x4xf32, #tpu.memory_space<vmem>>, vector<8x1xf32>
    %c0_24 = arith.constant 0 : index
    %c1 = arith.constant 1 : index
    %93 = vector.load %arg3[%c0_24, %c1] : memref<8x4xf32, #tpu.memory_space<vmem>>, vector<8x1xf32>
    %cst_25 = arith.constant dense<0.000000e+00> : vector<8xf32>
    %94 = vector.multi_reduction <add>, %91, %cst_25 [1] : vector<8x256xf32> to vector<8xf32>
    %95 = vector.shape_cast %94 : vector<8xf32> to vector<8x1xf32>
    %cst_26 = arith.constant 3.906250e-03 : f32
    %96 = vector.broadcast %cst_26 : f32 to vector<8x1xf32>
    %97 = arith.mulf %95, %96 : vector<8x1xf32>
    %98 = vector.broadcast %97 : vector<8x1xf32> to vector<8x256xf32>
    %99 = arith.subf %91, %98 : vector<8x256xf32>
    %100 = arith.mulf %99, %99 : vector<8x256xf32>
    %cst_27 = arith.constant dense<0.000000e+00> : vector<8xf32>
    %101 = vector.multi_reduction <add>, %100, %cst_27 [1] : vector<8x256xf32> to vector<8xf32>
    %102 = vector.shape_cast %101 : vector<8xf32> to vector<8x1xf32>
    %cst_28 = arith.constant 3.906250e-03 : f32
    %103 = vector.broadcast %cst_28 : f32 to vector<8x1xf32>
    %104 = arith.mulf %102, %103 : vector<8x1xf32>
    %cst_29 = arith.constant 9.99999974E-6 : f32
    %105 = vector.broadcast %cst_29 : f32 to vector<8x1xf32>
    %106 = arith.addf %104, %105 : vector<8x1xf32>
    %107 = math.rsqrt %106 : vector<8x1xf32>
    %108 = arith.mulf %92, %107 : vector<8x1xf32>
    %109 = vector.broadcast %108 : vector<8x1xf32> to vector<8x256xf32>
    %110 = arith.mulf %99, %109 : vector<8x256xf32>
    %111 = vector.broadcast %93 : vector<8x1xf32> to vector<8x256xf32>
    %112 = arith.addf %110, %111 : vector<8x256xf32>
    %cst_30 = arith.constant 0.000000e+00 : f32
    %113 = vector.broadcast %cst_30 : f32 to vector<8x256xf32>
    %114 = arith.cmpf ogt, %112, %113 : vector<8x256xf32>
    %cst_31 = arith.constant 0.00999999977 : f32
    %115 = vector.broadcast %cst_31 : f32 to vector<8x256xf32>
    %116 = arith.mulf %115, %112 : vector<8x256xf32>
    %117 = arith.select %114, %112, %116 : vector<8x256xi1>, vector<8x256xf32>
    %c0_32 = arith.constant 0 : index
    %c0_33 = arith.constant 0 : index
    %118 = vector.load %arg2[%c0_32, %c0_33] : memref<8x88xbf16, #tpu.memory_space<vmem>>, vector<8x88xbf16>
    %c5_i32_34 = arith.constant 5 : i32
    %119 = tpu.dynamic_rotate %117 by %c5_i32_34 dim 1 : vector<8x256xf32>, i32 -> vector<8x256xf32>
    %cst_35 = arith.constant 0.000000e+00 : f32
    %120 = vector.shape_cast %36 : vector<1x256xi1> to vector<1x256xi1>
    %121 = vector.broadcast %120 : vector<1x256xi1> to vector<8x256xi1>
    %122 = vector.broadcast %cst_35 : f32 to vector<8x256xf32>
    %123 = arith.select %121, %119, %122 : vector<8x256xi1>, vector<8x256xf32>
    %c4_i32_36 = arith.constant 4 : i32
    %124 = tpu.dynamic_rotate %117 by %c4_i32_36 dim 1 : vector<8x256xf32>, i32 -> vector<8x256xf32>
    %cst_37 = arith.constant 0.000000e+00 : f32
    %125 = vector.shape_cast %34 : vector<1x256xi1> to vector<1x256xi1>
    %126 = vector.broadcast %125 : vector<1x256xi1> to vector<8x256xi1>
    %127 = vector.broadcast %cst_37 : f32 to vector<8x256xf32>
    %128 = arith.select %126, %124, %127 : vector<8x256xi1>, vector<8x256xf32>
    %c3_i32_38 = arith.constant 3 : i32
    %129 = tpu.dynamic_rotate %117 by %c3_i32_38 dim 1 : vector<8x256xf32>, i32 -> vector<8x256xf32>
    %cst_39 = arith.constant 0.000000e+00 : f32
    %130 = vector.shape_cast %32 : vector<1x256xi1> to vector<1x256xi1>
    %131 = vector.broadcast %130 : vector<1x256xi1> to vector<8x256xi1>
    %132 = vector.broadcast %cst_39 : f32 to vector<8x256xf32>
    %133 = arith.select %131, %129, %132 : vector<8x256xi1>, vector<8x256xf32>
    %c2_i32_40 = arith.constant 2 : i32
    %134 = tpu.dynamic_rotate %117 by %c2_i32_40 dim 1 : vector<8x256xf32>, i32 -> vector<8x256xf32>
    %cst_41 = arith.constant 0.000000e+00 : f32
    %135 = vector.shape_cast %30 : vector<1x256xi1> to vector<1x256xi1>
    %136 = vector.broadcast %135 : vector<1x256xi1> to vector<8x256xi1>
    %137 = vector.broadcast %cst_41 : f32 to vector<8x256xf32>
    %138 = arith.select %136, %134, %137 : vector<8x256xi1>, vector<8x256xf32>
    %c1_i32_42 = arith.constant 1 : i32
    %139 = tpu.dynamic_rotate %117 by %c1_i32_42 dim 1 : vector<8x256xf32>, i32 -> vector<8x256xf32>
    %cst_43 = arith.constant 0.000000e+00 : f32
    %140 = vector.shape_cast %28 : vector<1x256xi1> to vector<1x256xi1>
    %141 = vector.broadcast %140 : vector<1x256xi1> to vector<8x256xi1>
    %142 = vector.broadcast %cst_43 : f32 to vector<8x256xf32>
    %143 = arith.select %141, %139, %142 : vector<8x256xi1>, vector<8x256xf32>
    %c255_i32_44 = arith.constant 255 : i32
    %144 = tpu.dynamic_rotate %117 by %c255_i32_44 dim 1 : vector<8x256xf32>, i32 -> vector<8x256xf32>
    %cst_45 = arith.constant 0.000000e+00 : f32
    %145 = vector.shape_cast %18 : vector<1x256xi1> to vector<1x256xi1>
    %146 = vector.broadcast %145 : vector<1x256xi1> to vector<8x256xi1>
    %147 = vector.broadcast %cst_45 : f32 to vector<8x256xf32>
    %148 = arith.select %146, %144, %147 : vector<8x256xi1>, vector<8x256xf32>
    %c254_i32_46 = arith.constant 254 : i32
    %149 = tpu.dynamic_rotate %117 by %c254_i32_46 dim 1 : vector<8x256xf32>, i32 -> vector<8x256xf32>
    %cst_47 = arith.constant 0.000000e+00 : f32
    %150 = vector.shape_cast %20 : vector<1x256xi1> to vector<1x256xi1>
    %151 = vector.broadcast %150 : vector<1x256xi1> to vector<8x256xi1>
    %152 = vector.broadcast %cst_47 : f32 to vector<8x256xf32>
    %153 = arith.select %151, %149, %152 : vector<8x256xi1>, vector<8x256xf32>
    %c253_i32_48 = arith.constant 253 : i32
    %154 = tpu.dynamic_rotate %117 by %c253_i32_48 dim 1 : vector<8x256xf32>, i32 -> vector<8x256xf32>
    %cst_49 = arith.constant 0.000000e+00 : f32
    %155 = vector.shape_cast %22 : vector<1x256xi1> to vector<1x256xi1>
    %156 = vector.broadcast %155 : vector<1x256xi1> to vector<8x256xi1>
    %157 = vector.broadcast %cst_49 : f32 to vector<8x256xf32>
    %158 = arith.select %156, %154, %157 : vector<8x256xi1>, vector<8x256xf32>
    %c252_i32_50 = arith.constant 252 : i32
    %159 = tpu.dynamic_rotate %117 by %c252_i32_50 dim 1 : vector<8x256xf32>, i32 -> vector<8x256xf32>
    %cst_51 = arith.constant 0.000000e+00 : f32
    %160 = vector.shape_cast %24 : vector<1x256xi1> to vector<1x256xi1>
    %161 = vector.broadcast %160 : vector<1x256xi1> to vector<8x256xi1>
    %162 = vector.broadcast %cst_51 : f32 to vector<8x256xf32>
    %163 = arith.select %161, %159, %162 : vector<8x256xi1>, vector<8x256xf32>
    %c251_i32_52 = arith.constant 251 : i32
    %164 = tpu.dynamic_rotate %117 by %c251_i32_52 dim 1 : vector<8x256xf32>, i32 -> vector<8x256xf32>
    %cst_53 = arith.constant 0.000000e+00 : f32
    %165 = vector.shape_cast %26 : vector<1x256xi1> to vector<1x256xi1>
    %166 = vector.broadcast %165 : vector<1x256xi1> to vector<8x256xi1>
    %167 = vector.broadcast %cst_53 : f32 to vector<8x256xf32>
    %168 = arith.select %166, %164, %167 : vector<8x256xi1>, vector<8x256xf32>
    %169 = tpu.concatenate %123, %128, %133, %138, %143, %117, %148, %153, %158, %163, %168 in 0 : vector<8x256xf32>, vector<8x256xf32>, vector<8x256xf32>, vector<8x256xf32>, vector<8x256xf32>, vector<8x256xf32>, vector<8x256xf32>, vector<8x256xf32>, vector<8x256xf32>, vector<8x256xf32>, vector<8x256xf32> -> vector<88x256xf32>
    %170 = arith.truncf %169 : vector<88x256xf32> to vector<88x256xbf16>
    %cst_54 = arith.constant dense<0.000000e+00> : vector<8x256xf32>
    %171 = tpu.matmul %118, %170, %cst_54 {dimension_numbers = #tpu.dot_dimension_numbers<[1], [0], [0], [1], [0, 0, 1, 1], [], []>} : vector<8x88xbf16>, vector<88x256xbf16>, vector<8x256xf32> -> vector<8x256xf32>
    %c0_55 = arith.constant 0 : index
    %c2 = arith.constant 2 : index
    %172 = vector.load %arg3[%c0_55, %c2] : memref<8x4xf32, #tpu.memory_space<vmem>>, vector<8x1xf32>
    %c0_56 = arith.constant 0 : index
    %c3 = arith.constant 3 : index
    %173 = vector.load %arg3[%c0_56, %c3] : memref<8x4xf32, #tpu.memory_space<vmem>>, vector<8x1xf32>
    %cst_57 = arith.constant dense<0.000000e+00> : vector<8xf32>
    %174 = vector.multi_reduction <add>, %171, %cst_57 [1] : vector<8x256xf32> to vector<8xf32>
    %175 = vector.shape_cast %174 : vector<8xf32> to vector<8x1xf32>
    %cst_58 = arith.constant 3.906250e-03 : f32
    %176 = vector.broadcast %cst_58 : f32 to vector<8x1xf32>
    %177 = arith.mulf %175, %176 : vector<8x1xf32>
    %178 = vector.broadcast %177 : vector<8x1xf32> to vector<8x256xf32>
    %179 = arith.subf %171, %178 : vector<8x256xf32>
    %180 = arith.mulf %179, %179 : vector<8x256xf32>
    %cst_59 = arith.constant dense<0.000000e+00> : vector<8xf32>
    %181 = vector.multi_reduction <add>, %180, %cst_59 [1] : vector<8x256xf32> to vector<8xf32>
    %182 = vector.shape_cast %181 : vector<8xf32> to vector<8x1xf32>
    %cst_60 = arith.constant 3.906250e-03 : f32
    %183 = vector.broadcast %cst_60 : f32 to vector<8x1xf32>
    %184 = arith.mulf %182, %183 : vector<8x1xf32>
    %cst_61 = arith.constant 9.99999974E-6 : f32
    %185 = vector.broadcast %cst_61 : f32 to vector<8x1xf32>
    %186 = arith.addf %184, %185 : vector<8x1xf32>
    %187 = math.rsqrt %186 : vector<8x1xf32>
    %188 = arith.mulf %172, %187 : vector<8x1xf32>
    %189 = vector.broadcast %188 : vector<8x1xf32> to vector<8x256xf32>
    %190 = arith.mulf %179, %189 : vector<8x256xf32>
    %191 = vector.broadcast %173 : vector<8x1xf32> to vector<8x256xf32>
    %192 = arith.addf %190, %191 : vector<8x256xf32>
    %cst_62 = arith.constant 0.000000e+00 : f32
    %193 = vector.broadcast %cst_62 : f32 to vector<8x256xf32>
    %194 = arith.cmpf ogt, %192, %193 : vector<8x256xf32>
    %cst_63 = arith.constant 0.00999999977 : f32
    %195 = vector.broadcast %cst_63 : f32 to vector<8x256xf32>
    %196 = arith.mulf %195, %192 : vector<8x256xf32>
    %197 = arith.select %194, %192, %196 : vector<8x256xi1>, vector<8x256xf32>
    %c0_64 = arith.constant 0 : index
    %c0_65 = arith.constant 0 : index
    %198 = vector.load %arg4[%c0_64, %c0_65] : memref<8x256xf32, #tpu.memory_space<vmem>>, vector<8x256xf32>
    tpu.vector_store %arg4[%c0_64, %c0_65], %197 {strides = array<i32>} : memref<8x256xf32, #tpu.memory_space<vmem>>, vector<8x256xf32>,
    return
  }
}

</mosaic_0001>

<bundles_post_ra>
// kernel: tpu_custom_call.1
= control target key start
LH: loop header
LB: loop body
LE: loop exit
PB: predicated region body
PF: predicated region fallthrough
CT: control target
= control target key end

     0   :  { %9 = vsyncpa [#allocation3], 0  ;;  %s1066_s0 = inlined_call_operand.hbm [shape: f32[8,256], index: 0, kind: input, shape index: {}]   ;;  %s1067_s1 = inlined_call_operand.vmem [shape: bf16[8,88], index: 1, kind: input, shape index: {}]   ;;  %s1068_s2 = inlined_call_operand.vmem [shape: bf16[8,88], index: 2, kind: input, shape index: {}]   ;;  %s1069_s3 = inlined_call_operand.vmem [shape: f32[8,4], index: 3, kind: input, shape index: {}]   ;;  %s1070_s4 = inlined_call_operand.hbm [shape: f32[8,256], index: 4, kind: output, shape index: {}]  }
   0x1   :  { %10 = vsyncpa [#allocation4], 0  ;;  %s739_s15 = smov [#allocation2]  }
   0x2   :  { %s17_s16 = sshll.u32 %s739_s15, 4  ;;  %s18_s16 = int_to_ptr.vmem [resolvable:$true] %s17_s16 }
   0x3   :  { %s703_s17 = scalar_lea.vmem %s18_s16, 256  ;;  %p708_p1 = scmp.lt.s32.totalorder %s18_s16, %s18_s16 }
   0x4   :  { %p704_p0 = scmp.ne.s32.totalorder %s18_s16, %s703_s17  ;;  %p709_p2 = scmp.lt.s32.totalorder %s703_s17, %s703_s17 }
   0x6   :  { %p710_p3 = por %p709_p2, %p708_p1 }
   0x8   :  { %p711_p4 = pnand %p710_p3, %p704_p0 }
   0xa   :  { %714 = shalt.err (!%p711_p4)
}
   0xb   :  { %20 = dma.hbm_to_vmem [thread:$0]  %s1066_s0, 256, %s18_s16, [#allocation3]  }
   0xc   :  { %735 = dma.done.wait [#allocation3], 256  }
   0xd   :  { %736 = vsyncadd [#allocation3], 4294967040  ;;  %v784_v0 = vld [vmem:[#allocation2] sm:$0xff]  ;;  %v786_v1 = vld [vmem:[#allocation2 + $0x8] sm:$0xff]  ;;  %s740_s20 = smov 123   ;;  %s741_s21 = smov 124   ;;  %v31_v4 = vlaneseq }
   0xe   :  { %v586_v2 = vpack.i.bf16 %v786_v1, %v784_v0  ;;  %s742_s22 = smov 125   ;;  %s743_s23 = smov 127   ;;  %v748_v3 = vmov 0   ;;  %vm1076_vm4 = vcmask 1043456  }
   0xf   :  { %s744_s0 = smov 126   ;;  %s745_s24 = smov 1   ;;  %266 = vmatprep.mubr.bf16.mxu0 %v748_v3  ;;  %636 = vset.pattern.permute.xlu0 %v748_v3  ;;  %v800_v5 = vand.u32 127, %v31_v4 }
  0x10   :  { %587 = vrot.lane.b32.xlu0 %v586_v2, %s740_s20  ;;  %597 = vrot.lane.b32.xlu1 %v586_v2, %s741_s21  ;;  %s746_s25 = smov 2   ;;  %s747_s26 = smov 3  }
  0x11   :  { %s749_s27 = smov 4   ;;  %s750_s28 = smov 5   ;;  %445 = vmatprep.mubr.bf16.mxu1 %v748_v3  ;;  %v33_v6 = vadd.s32 128, %v800_v5  ;;  %vm1074_vm0 = vcmp.lt.s32.totalorder %v800_v5, 124  ;;  %vm1080_vm1 = vcmp.lt.s32.totalorder %v800_v5, 123  ;;  %vm1075_vm3 = vcmp.lt.s32.totalorder %v800_v5, 125 }
  0x12   :  { %vm1073_vm5 = vcmp.lt.s32.totalorder %v800_v5, 127  ;;  %vm1072_vm6 = vcmp.lt.s32.totalorder %v800_v5, 126  ;;  %vm1071_vm9 = vcmp.lt.s32.totalorder %v800_v5, 1  ;;  %vm850_vm13 = vmpackc.low %vm1074_vm0, %vm1075_vm3  ;;  %vm1077_vm14 = vcmp.lt.s32.totalorder %v800_v5, 2 }
  0x13   :  { %v803_v7 = vand.u32 127, %v33_v6  ;;  %vm1078_vm15 = vcmp.lt.s32.totalorder %v800_v5, 3 }
  0x14   :  { %592 = vrot.lane.b32.xlu0 %v586_v2, %s742_s22  ;;  %602 = vrot.lane.b32.xlu1 %v586_v2, %s743_s23 }
  0x15   :  { %vm1079_vm2 = vcmp.lt.s32.totalorder %v803_v7, 123  ;;  %vm63_vm7 = vcmp.lt.s32.totalorder %v803_v7, 125  ;;  %vm65_vm8 = vcmp.lt.s32.totalorder %v803_v7, 124  ;;  %vm59_vm10 = vcmp.lt.s32.totalorder %v803_v7, 127 }
  0x16   :  { %vm837_vm11 = vmpackc.low %vm65_vm8, %vm63_vm7  ;;  %vm61_vm12 = vcmp.lt.s32.totalorder %v803_v7, 126  ;;  %vm69_vm7 = vcmp.ge.s32.totalorder %v803_v7, 1 }
  0x17   :  { %vm869_vm8 = vmpackc.low %vm61_vm12, %vm59_vm10  ;;  %vm751_vm12 = vmmov 1  }
  0x18   :  { %607 = vrot.lane.b32.xlu0 %v586_v2, %s744_s0  ;;  %612 = vrot.lane.b32.xlu1 %v586_v2, %s745_s24  ;;  %vm882_vm10 = vmpackc.low %vm1072_vm6, %vm1073_vm5 }
  0x1c   :  { %622 = vrot.lane.b32.xlu1 %v586_v2, %s746_s25  ;;  %617 = vrot.lane.b32.xlu0 %v586_v2, %s747_s26 }
  0x20   :  { %632 = vrot.lane.b32.xlu1 %v586_v2, %s749_s27  ;;  %627 = vrot.lane.b32.xlu0 %v586_v2, %s750_s28 }
  0x82   :  { %v588_v8 = vpop.permute.xlu0 %587  ;;  %v598_v9 = vpop.permute.xlu1 %597 }
  0x83   :  { %v590_v10 = vunpack.i.h.bf16 %v588_v8  ;;  %v589_v11 = vunpack.i.l.bf16 %v588_v8  ;;  %v600_v12 = vunpack.i.h.bf16 %v598_v9  ;;  %v599_v13 = vunpack.i.l.bf16 %v598_v9 }
  0x85   :  { %v204_v14 = vsel %vm1080_vm1, %v590_v10, %v589_v11  ;;  %v203_v15 = vsel %vm1080_vm1, %v589_v11, %v590_v10  ;;  %v190_v16 = vsel %vm1074_vm0, %v599_v13, %v600_v12  ;;  %v191_v17 = vsel %vm1074_vm0, %v600_v12, %v599_v13  ;;  %v311_v10 = vld [vmem:[%s1068_s2] sm:$0xf]  ;;  %s755_s2 = smov [#allocation5]  }
  0x86   :  { %v593_v18 = vpop.permute.xlu0 %592  ;;  %v210_v19 = vsel %vm1079_vm2, %v204_v14, 0.0  ;;  %v209_v20 = vsel %vm1080_vm1, %v203_v15, 0.0  ;;  %v603_v21 = vpop.permute.xlu1 %602  ;;  %vm85_vm0 = vcmp.lt.s32.totalorder %v800_v5, 5  ;;  %vm72_vm2 = vcmp.ge.s32.totalorder %v800_v5, 3  ;;  %s496_s7 = sshll.u32 %s755_s2, 4  ;;  %s497_s7 = int_to_ptr.vmem [resolvable:$true] %s496_s7 }
  0x87   :  { %v595_v22 = vunpack.i.h.bf16 %v593_v18  ;;  %v594_v23 = vunpack.i.l.bf16 %v593_v18  ;;  %v222_v24 = vpack.c.bf16 %v210_v19, %v210_v19  ;;  %v221_v25 = vpack.c.bf16 %v209_v20, %v209_v20  ;;  %s715_s8 = scalar_lea.vmem %s497_s7, 256  ;;  %p720_p6 = scmp.lt.s32.totalorder %s497_s7, %s497_s7 }
  0x88   :  { %v605_v26 = vunpack.i.h.bf16 %v603_v21  ;;  %v604_v27 = vunpack.i.l.bf16 %v603_v21  ;;  %vm74_vm1 = vcmp.ge.s32.totalorder %v800_v5, 4  ;;  %v78_v21 = vld [vmem:[%s1067_s1] sm:$0xf]  ;;  %p716_p5 = scmp.ne.s32.totalorder %s497_s7, %s715_s8  ;;  %p721_p7 = scmp.lt.s32.totalorder %s715_s8, %s715_s8 }
  0x89   :  { %v177_v28 = vsel %vm1075_vm3, %v594_v23, %v595_v22  ;;  %v178_v29 = vsel %vm1075_vm3, %v595_v22, %v594_v23  ;;  %505 = vmatprep.subr.msk.bf16.mxu0 %vm1076_vm4, %v222_v24  ;;  %v229_v30 = vsel %vm1076_vm4, %v221_v25, 0  ;;  %vm71_vm3 = vcmp.ge.s32.totalorder %v803_v7, 2 }
  0x8a   :  { %v507_v32 = vpack.c.bf16 %v191_v17, %v178_v29  ;;  %v510_v33 = vpack.c.bf16 %v190_v16, %v177_v28  ;;  %239 = vmatpush1.bf16.msra.mxu0 %v229_v30  ;;  %v151_v34 = vsel %vm1073_vm5, %v604_v27, %v605_v26  ;;  %v152_v35 = vsel %vm1073_vm5, %v605_v26, %v604_v27  ;;  %v608_v36 = vpop.permute.xlu0 %607  ;;  %v613_v37 = vpop.permute.xlu1 %612  ;;  %p722_p8 = por %p721_p7, %p720_p6 }
  0x8b   :  { %v610_v38 = vunpack.i.h.bf16 %v608_v36  ;;  %v609_v39 = vunpack.i.l.bf16 %v608_v36  ;;  %v615_v41 = vunpack.i.h.bf16 %v613_v37  ;;  %v614_v42 = vunpack.i.l.bf16 %v613_v37 }
  0x8c   :  { %508 = vmatprep.subr.msk.bf16.mxu0 %vm837_vm11, %v507_v32  ;;  %vm1082_vm5 = vcmp.lt.s32.totalorder %v800_v5, 4  ;;  %vm73_vm4 = vcmp.ge.s32.totalorder %v803_v7, 3  ;;  %v752_v36 = vmov 1   ;;  %p723_p9 = pnand %p722_p8, %p716_p5 }
  0x8d   :  { %v164_v43 = vsel %vm1072_vm6, %v609_v39, %v610_v38  ;;  %v165_v44 = vsel %vm1072_vm6, %v610_v38, %v609_v39  ;;  %v138_v45 = vsel %vm1071_vm9, %v614_v42, %v615_v41  ;;  %v139_v49 = vsel %vm1071_vm9, %v615_v41, %v614_v42  ;;  %vm891_vm9 = vmpackc.low %vm751_vm12, %vm69_vm7  ;;  %637 = vset.pattern.permute.xlu1 %v752_v36 }
  0x8e   :  { %v513_v47 = vpack.c.bf16 %v165_v44, %v152_v35  ;;  %v516_v48 = vpack.c.bf16 %v164_v43, %v151_v34  ;;  %511 = vmatpush1.bf16.msk.msra.mxu0 %vm850_vm13, %v510_v33  ;;  %v519_v50 = vpack.c.bf16 %v786_v1, %v138_v45  ;;  %v623_v51 = vpop.permute.xlu1 %622  ;;  %v618_v52 = vpop.permute.xlu0 %617  ;;  %vm68_vm6 = vcmp.ge.s32.totalorder %v800_v5, 1  ;;  %v969_v35 = vld [vmem:[%s1069_s3] sm:$0xff] }
  0x8f   :  { %v625_v54 = vunpack.i.h.bf16 %v623_v51  ;;  %v624_v55 = vunpack.i.l.bf16 %v623_v51  ;;  %v620_v56 = vunpack.i.h.bf16 %v618_v52  ;;  %v619_v57 = vunpack.i.l.bf16 %v618_v52  ;;  %vm916_vm7 = vmpackc.low %vm751_vm12, %vm68_vm6 }
  0x90   :  { %514 = vmatprep.subr.msk.bf16.mxu0 %vm869_vm8, %v513_v47  ;;  %v522_v61 = vpack.c.bf16 %v784_v0, %v139_v49  ;;  %v1094_v0 = vmov 0  ;;  %vm75_vm6 = vcmp.ge.s32.totalorder %v803_v7, 4  ;;  %vm77_vm12 = vcmp.ge.s32.totalorder %v803_v7, 5 }
  0x91   :  { %v125_v59 = vsel %vm1077_vm14, %v624_v55, %v625_v54  ;;  %v112_v60 = vsel %vm1078_vm15, %v619_v57, %v620_v56  ;;  %v126_v62 = vsel %vm1077_vm14, %v625_v54, %v624_v55  ;;  %v113_v63 = vsel %vm1078_vm15, %v620_v56, %v619_v57  ;;  %vm922_vm14 = vmpackc.low %vm71_vm3, %vm73_vm4 }
  0x92   :  { %517 = vmatpush1.bf16.msk.msra.mxu0 %vm882_vm10, %v516_v48  ;;  %v525_v1 = vpack.c.bf16 %v125_v59, %v112_v60  ;;  %v633_v2 = vpop.permute.xlu1 %632  ;;  %v628_v3 = vpop.permute.xlu0 %627  ;;  %v1095_v0 = vsel %vm916_vm7, 4294967295, %v1094_v0  ;;  %vm70_vm15 = vcmp.ge.s32.totalorder %v800_v5, 2  ;;  %v528_v13 = vpack.c.bf16 %v126_v62, %v113_v63  ;;  %vm946_vm4 = vmpackc.low %vm75_vm6, %vm77_vm12 }
  0x93   :  { %520 = vmatprep.subr.msk.bf16.mxu0 %vm891_vm9, %v519_v50  ;;  %v635_v4 = vunpack.i.h.bf16 %v633_v2  ;;  %v634_v6 = vunpack.i.l.bf16 %v633_v2  ;;  %v630_v8 = vunpack.i.h.bf16 %v628_v3  ;;  %v629_v9 = vunpack.i.l.bf16 %v628_v3  ;;  %vm942_vm3 = vmpackc.low %vm70_vm15, %vm72_vm2 }
  0x94   :  { %vm1083_vm2 = vcmask 719872   ;;  %vm1106_vm12 = vcmp.lt.s32.totalorder %v803_v7, 123 }
  0x95   :  { %v99_v11 = vsel %vm1082_vm5, %v634_v6, %v635_v4  ;;  %v86_v12 = vsel %vm85_vm0, %v629_v9, %v630_v8  ;;  %v100_v14 = vsel %vm1082_vm5, %v635_v4, %v634_v6  ;;  %v87_v15 = vsel %vm85_vm0, %v630_v8, %v629_v9 }
  0x96   :  { %523 = vmatpush1.bf16.msk.msra.mxu0 %vm916_vm7, %v522_v61  ;;  %v531_v16 = vpack.c.bf16 %v99_v11, %v86_v12  ;;  %vm76_vm7 = vcmp.ge.s32.totalorder %v800_v5, 5  ;;  %v534_v19 = vpack.c.bf16 %v100_v14, %v87_v15 }
  0x97   :  { %526 = vmatprep.subr.msk.bf16.mxu0 %vm922_vm14, %v525_v1  ;;  %vm956_vm5 = vmpackc.low %vm74_vm1, %vm76_vm7  ;;  %vm1104_vm7 = vcmp.lt.s32.totalorder %v800_v5, 123 }
  0x98   :  { %vm1105_vm6 = vmmov %vm1104_vm7 }
  0x9a   :  { %529 = vmatpush1.bf16.msk.msra.mxu0 %vm942_vm3, %v528_v13 }
  0x9b   :  { %532 = vmatprep.subr.msk.bf16.mxu0 %vm946_vm4, %v531_v16 }
  0x9e   :  { %535 = vmatpush1.bf16.msk.msra.mxu0 %vm956_vm5, %v534_v19 }
  0xa1   :  { %536 = vmatmul.mubr.msk.bf16.vlgmr.msra.gmra.mxu0 %vm1083_vm2, %v78_v21 }
 0x161   :  { %v268_v22 = vpop.f32.mrf.mxu0 }
 0x163   :  { %v270_v23 = vpop.f32.mrf.mxu0 }
 0x164   :  { %v276_v24 = vadd.f32 %v270_v23, %v268_v22 }
 0x165   :  { %v272_v25 = vpop.f32.mrf.mxu0 }
 0x166   :  { %277 = vadd.xlane.f32.xlu0 %v276_v24 }
 0x167   :  { %v273_v26 = vpop.f32.mrf.mxu0 }
 0x1ef   :  { %v278_v27 = vpop.xlane.xlu0 %277 }
 0x1f0   :  { %v279_v28 = vmul.f32 0.00390625, %v278_v27 }
 0x1f2   :  { %v280_v29 = vsub.f32 %v268_v22, %v279_v28  ;;  %v281_v30 = vsub.f32 %v270_v23, %v279_v28 }
 0x1f4   :  { %v282_v32 = vmul.f32 %v280_v29, %v280_v29  ;;  %v283_v33 = vmul.f32 %v281_v30, %v281_v30 }
 0x1f6   :  { %v284_v34 = vadd.f32 %v283_v33, %v282_v32 }
 0x1f8   :  { %285 = vadd.xlane.f32.xlu1 %v284_v34 }
 0x209   :  { %300 = vperm.xlu1 %637, %v969_v35  }
 0x281   :  { %v286_v37 = vpop.xlane.xlu1 %285 }
 0x282   :  { %v287_v38 = vmul.f32 0.00390625, %v286_v37 }
 0x284   :  { %v288_v39 = vadd.f32 1e-05, %v287_v38 }
 0x285   :  { %v301_v44 = vpop.permute.xlu1 %300 }
 0x286   :  { %691 = vrsqrt.f32 %v288_v39 }
 0x293   :  { %v692_v41 = vpop.eup %691 }
 0x294   :  { %v290_v42 = vmul.f32 %v692_v41, %v969_v35 }
 0x296   :  { %293 = vperm.xlu0 %636, %v290_v42  }
 0x311   :  { %v294_v43 = vpop.permute.xlu0 %293 }
 0x312   :  { %v296_v45 = vmul.f32 %v294_v43, %v280_v29  ;;  %v297_v47 = vmul.f32 %v294_v43, %v281_v30 }
 0x314   :  { %v303_v48 = vadd.f32 %v301_v44, %v296_v45  ;;  %v304_v49 = vadd.f32 %v301_v44, %v297_v47 }
 0x316   :  { %vm305_vm1 = vcmp.gt.f32.partialorder %v303_v48, 0.0  ;;  %vm306_vm15 = vcmp.gt.f32.partialorder %v304_v49, 0.0  ;;  %v307_v50 = vmul.f32 0.01, %v303_v48  ;;  %v308_v51 = vmul.f32 0.01, %v304_v49 }
 0x318   :  { %v973_v52 = vsel %vm305_vm1, %v303_v48, %v307_v50  ;;  %v975_v54 = vsel %vm306_vm15, %v304_v49, %v308_v51  ;;  %vm1107_vm1 = vmmov %vm1105_vm6  ;;  %vm1108_vm15 = vcmask 1043456  }
 0x319   :  { %v668_v55 = vpack.i.bf16 %v975_v54, %v973_v52  ;;  %vm1109_vm2 = vmmov %vm1108_vm15 }
 0x31b   :  { %669 = vrot.lane.b32.xlu0 %v668_v55, %s747_s26  ;;  %639 = vrot.lane.b32.xlu1 %v668_v55, %s740_s20 }
 0x31f   :  { %679 = vrot.lane.b32.xlu0 %v668_v55, %s750_s28  ;;  %644 = vrot.lane.b32.xlu1 %v668_v55, %s742_s22 }
 0x323   :  { %649 = vrot.lane.b32.xlu1 %v668_v55, %s741_s21 }
 0x327   :  { %654 = vrot.lane.b32.xlu1 %v668_v55, %s743_s23 }
 0x32b   :  { %659 = vrot.lane.b32.xlu1 %v668_v55, %s744_s0 }
 0x32f   :  { %664 = vrot.lane.b32.xlu1 %v668_v55, %s745_s24 }
 0x333   :  { %674 = vrot.lane.b32.xlu1 %v668_v55, %s746_s25 }
 0x337   :  { %684 = vrot.lane.b32.xlu1 %v668_v55, %s749_s27 }
 0x38d   :  { %v640_v56 = vpop.permute.xlu1 %639  ;;  %v670_v27 = vpop.permute.xlu0 %669 }
 0x38e   :  { %v642_v57 = vunpack.i.h.bf16 %v640_v56  ;;  %v641_v59 = vunpack.i.l.bf16 %v640_v56  ;;  %v672_v37 = vunpack.i.h.bf16 %v670_v27  ;;  %v671_v38 = vunpack.i.l.bf16 %v670_v27 }
 0x390   :  { %v389_v60 = vsel %vm1104_vm7, %v642_v57, %v641_v59  ;;  %v388_v61 = vsel %vm1105_vm6, %v641_v59, %v642_v57  ;;  %vm1110_vm7 = vcmp.lt.s32.totalorder %v800_v5, 125 }
 0x391   :  { %v645_v62 = vpop.permute.xlu1 %644  ;;  %v391_v63 = vsel %vm1106_vm12, %v389_v60, 0.0  ;;  %v390_v1 = vsel %vm1107_vm1, %v388_v61, 0.0  ;;  %vm1111_vm6 = vmmov %vm1110_vm7  ;;  %vm1112_vm12 = vcmp.lt.s32.totalorder %v800_v5, 124  ;;  %v680_v42 = vpop.permute.xlu0 %679 }
 0x392   :  { %v403_v2 = vpack.c.bf16 %v391_v63, %v391_v63  ;;  %v402_v3 = vpack.c.bf16 %v390_v1, %v390_v1  ;;  %v647_v4 = vunpack.i.h.bf16 %v645_v62  ;;  %v646_v6 = vunpack.i.l.bf16 %v645_v62  ;;  %vm1113_vm1 = vmmov %vm1112_vm12 }
 0x393   :  { %v682_v50 = vunpack.i.h.bf16 %v680_v42  ;;  %v681_v53 = vunpack.i.l.bf16 %v680_v42 }
 0x394   :  { %537 = vmatprep.subr.msk.bf16.mxu1 %vm1108_vm15, %v403_v2  ;;  %v408_v9 = vsel %vm1109_vm2, %v402_v3, 0  ;;  %v372_v13 = vsel %vm1110_vm7, %v646_v6, %v647_v4  ;;  %v373_v7 = vsel %vm1111_vm6, %v647_v4, %v646_v6  ;;  %vm1114_vm2 = vcmp.lt.s32.totalorder %v800_v5, 127 }
 0x395   :  { %v650_v8 = vpop.permute.xlu1 %649  ;;  %418 = vmatpush1.bf16.msra.mxu1 %v408_v9  ;;  %vm1115_vm15 = vmmov %vm1114_vm2  ;;  %vm1116_vm7 = vcmp.lt.s32.totalorder %v800_v5, 126  ;;  %v316_v58 = vsel %vm85_vm0, %v681_v53, %v682_v50  ;;  %v317_v60 = vsel %vm85_vm0, %v682_v50, %v681_v53  ;;  %vm1127_vm0 = vcmask 719872  }
 0x396   :  { %v652_v11 = vunpack.i.h.bf16 %v650_v8  ;;  %v651_v12 = vunpack.i.l.bf16 %v650_v8 }
 0x398   :  { %v380_v14 = vsel %vm1112_vm12, %v651_v12, %v652_v11  ;;  %v381_v15 = vsel %vm1113_vm1, %v652_v11, %v651_v12  ;;  %vm1120_vm12 = vcmp.lt.s32.totalorder %v800_v5, 3  ;;  %v753_v12 = vmov 2  }
 0x399   :  { %v539_v16 = vpack.c.bf16 %v381_v15, %v373_v7  ;;  %v542_v19 = vpack.c.bf16 %v380_v14, %v372_v13  ;;  %v655_v21 = vpop.permute.xlu1 %654  ;;  %v332_v46 = vsel %vm1120_vm12, %v671_v38, %v672_v37  ;;  %688 = vset.pattern.permute.xlu0 %v753_v12  ;;  %v754_v13 = vmov 3  }
 0x39a   :  { %v657_v22 = vunpack.i.h.bf16 %v655_v21  ;;  %v656_v23 = vunpack.i.l.bf16 %v655_v21  ;;  %689 = vset.pattern.permute.xlu1 %v754_v13 }
 0x39b   :  { %540 = vmatprep.subr.msk.bf16.mxu1 %vm837_vm11, %v539_v16  ;;  %vm1117_vm11 = vmmov %vm1116_vm7 }
 0x39c   :  { %543 = vmatpush1.bf16.msk.msra.mxu1 %vm850_vm13, %v542_v19  ;;  %v356_v28 = vsel %vm1114_vm2, %v656_v23, %v657_v22  ;;  %v357_v29 = vsel %vm1115_vm15, %v657_v22, %v656_v23  ;;  %vm1118_vm13 = vcmp.lt.s32.totalorder %v800_v5, 1  ;;  %vm1124_vm2 = vnez %v1095_v0 }
 0x39d   :  { %v660_v24 = vpop.permute.xlu1 %659  ;;  %vm1119_vm6 = vmmov %vm1118_vm13 }
 0x39e   :  { %v662_v25 = vunpack.i.h.bf16 %v660_v24  ;;  %v661_v26 = vunpack.i.l.bf16 %v660_v24 }
 0x3a0   :  { %v364_v30 = vsel %vm1116_vm7, %v661_v26, %v662_v25  ;;  %v365_v31 = vsel %vm1117_vm11, %v662_v25, %v661_v26 }
 0x3a1   :  { %v545_v32 = vpack.c.bf16 %v365_v31, %v357_v29  ;;  %v548_v33 = vpack.c.bf16 %v364_v30, %v356_v28  ;;  %v665_v40 = vpop.permute.xlu1 %664 }
 0x3a2   :  { %v667_v34 = vunpack.i.h.bf16 %v665_v40  ;;  %v666_v36 = vunpack.i.l.bf16 %v665_v40 }
 0x3a3   :  { %546 = vmatprep.subr.msk.bf16.mxu1 %vm869_vm8, %v545_v32  ;;  %vm1121_vm8 = vmmov %vm1120_vm12 }
 0x3a4   :  { %v348_v39 = vsel %vm1118_vm13, %v666_v36, %v667_v34  ;;  %v349_v41 = vsel %vm1119_vm6, %v667_v34, %v666_v36  ;;  %549 = vmatpush1.bf16.msk.msra.mxu1 %vm882_vm10, %v548_v33  ;;  %v333_v49 = vsel %vm1121_vm8, %v672_v37, %v671_v38  ;;  %vm1122_vm10 = vcmp.lt.s32.totalorder %v800_v5, 2 }
 0x3a5   :  { %v551_v43 = vpack.c.bf16 %v975_v54, %v348_v39  ;;  %v554_v44 = vpack.c.bf16 %v973_v52, %v349_v41  ;;  %v675_v45 = vpop.permute.xlu1 %674  ;;  %vm1123_vm1 = vmmov %vm1122_vm10 }
 0x3a6   :  { %v677_v47 = vunpack.i.h.bf16 %v675_v45  ;;  %v676_v48 = vunpack.i.l.bf16 %v675_v45 }
 0x3a7   :  { %552 = vmatprep.subr.msk.bf16.mxu1 %vm891_vm9, %v551_v43  ;;  %vm1125_vm9 = vcmp.lt.s32.totalorder %v800_v5, 4 }
 0x3a8   :  { %v340_v51 = vsel %vm1122_vm10, %v676_v48, %v677_v47  ;;  %v341_v52 = vsel %vm1123_vm1, %v677_v47, %v676_v48  ;;  %555 = vmatpush1.bf16.msk.msra.mxu1 %vm1124_vm2, %v554_v44  ;;  %vm1126_vm15 = vmmov %vm1125_vm9 }
 0x3a9   :  { %v557_v54 = vpack.c.bf16 %v340_v51, %v332_v46  ;;  %v560_v55 = vpack.c.bf16 %v341_v52, %v333_v49  ;;  %v685_v56 = vpop.permute.xlu1 %684 }
 0x3aa   :  { %v687_v57 = vunpack.i.h.bf16 %v685_v56  ;;  %v686_v59 = vunpack.i.l.bf16 %v685_v56 }
 0x3ab   :  { %558 = vmatprep.subr.msk.bf16.mxu1 %vm922_vm14, %v557_v54 }
 0x3ac   :  { %v324_v61 = vsel %vm1125_vm9, %v686_v59, %v687_v57  ;;  %v325_v0 = vsel %vm1126_vm15, %v687_v57, %v686_v59  ;;  %561 = vmatpush1.bf16.msk.msra.mxu1 %vm942_vm3, %v560_v55 }
 0x3ad   :  { %v563_v62 = vpack.c.bf16 %v324_v61, %v316_v58  ;;  %v566_v63 = vpack.c.bf16 %v325_v0, %v317_v60 }
 0x3af   :  { %564 = vmatprep.subr.msk.bf16.mxu1 %vm946_vm4, %v563_v62 }
 0x3b0   :  { %567 = vmatpush1.bf16.msk.msra.mxu1 %vm956_vm5, %v566_v63 }
 0x3b3   :  { %568 = vmatmul.mubr.msk.bf16.vlgmr.msra.gmra.mxu1 %vm1127_vm0, %v311_v10 }
 0x473   :  { %v447_v1 = vpop.f32.mrf.mxu1 }
 0x475   :  { %v449_v5 = vpop.f32.mrf.mxu1 }
 0x476   :  { %v454_v2 = vadd.f32 %v449_v5, %v447_v1 }
 0x477   :  { %v451_v3 = vpop.f32.mrf.mxu1 }
 0x478   :  { %455 = vadd.xlane.f32.xlu0 %v454_v2 }
 0x479   :  { %v452_v17 = vpop.f32.mrf.mxu1 }
 0x501   :  { %v456_v4 = vpop.xlane.xlu0 %455 }
 0x502   :  { %v457_v6 = vmul.f32 0.00390625, %v456_v4 }
 0x504   :  { %v458_v8 = vsub.f32 %v447_v1, %v457_v6  ;;  %v459_v18 = vsub.f32 %v449_v5, %v457_v6 }
 0x506   :  { %v460_v9 = vmul.f32 %v458_v8, %v458_v8  ;;  %v461_v11 = vmul.f32 %v459_v18, %v459_v18 }
 0x508   :  { %v462_v20 = vadd.f32 %v461_v11, %v460_v9 }
 0x50a   :  { %463 = vadd.xlane.f32.xlu1 %v462_v20 }
 0x51b   :  { %477 = vperm.xlu1 %689, %v969_v35  }
 0x593   :  { %v464_v7 = vpop.xlane.xlu1 %463 }
 0x594   :  { %v465_v14 = vmul.f32 0.00390625, %v464_v7 }
 0x596   :  { %v466_v15 = vadd.f32 1e-05, %v465_v14 }
 0x597   :  { %v478_v22 = vpop.permute.xlu1 %477 }
 0x598   :  { %693 = vrsqrt.f32 %v466_v15 }
 0x5a5   :  { %v694_v16 = vpop.eup %693 }
 0x5a6   :  { %v468_v19 = vmul.f32 %v694_v16, %v969_v35 }
 0x5a8   :  { %471 = vperm.xlu0 %688, %v468_v19  }
 0x5ac   :  { %690 = vset.pattern.permute.xlu0 %v754_v13 }
 0x623   :  { %v472_v21 = vpop.permute.xlu0 %471 }
 0x624   :  { %v474_v23 = vmul.f32 %v472_v21, %v458_v8  ;;  %v475_v24 = vmul.f32 %v472_v21, %v459_v18 }
 0x626   :  { %v480_v25 = vadd.f32 %v478_v22, %v474_v23  ;;  %v481_v26 = vadd.f32 %v478_v22, %v475_v24 }
 0x628   :  { %vm482_vm5 = vcmp.gt.f32.partialorder %v480_v25, 0.0  ;;  %vm483_vm14 = vcmp.gt.f32.partialorder %v481_v26, 0.0  ;;  %v484_v27 = vmul.f32 0.01, %v480_v25  ;;  %v485_v28 = vmul.f32 0.01, %v481_v26 }
 0x62a   :  { %v486_v29 = vsel %vm482_vm5, %v480_v25, %v484_v27  ;;  %v487_v30 = vsel %vm483_vm14, %v481_v26, %v485_v28 }
 0x62b   :  { %488 = vst [vmem:[#allocation5] sm:$0xff] %v486_v29  ;;  %489 = vst [vmem:[#allocation5 + $0x8] sm:$0xff] %v487_v30 }
 0x62c   :  { %726 = shalt.err (!%p723_p9)
}
 0x62d   :  { %499 = dma.vmem_to_hbm [thread:$0]  %s497_s7, 256, %s1070_s4, [#allocation4]  }
 0x62e   :  { %737 = dma.done.wait [#allocation4], 256  }
 0x62f   :  { %738 = vsyncadd [#allocation4], 4294967040 }
 0x630   :  { %503 = vsyncpa [#allocation3], 1 }
 0x631   :  { %504 = vsyncpa [#allocation4], 1 }

</bundles_post_ra>
